<compile_context>
chip_gen: v7x
topology: tpu7x:2x2x1
jax: 0.10.0
libtpu: 0.0.40
codegen_flags: <defaults>
</compile_context>

<pallas_src>
import functools
import math

import jax
import jax.numpy as jnp
import numpy as np
from jax.experimental import pallas as pl
from jax.experimental.pallas import tpu as pltpu


def _round_up(x, m):
    return -(-x // m) * m


def _attn_pool_kernel(x_ref, wvs_ref, bvs_ref, wo_t_ref, bo_ref, out_ref,
                      *, batch_tile, seq_len, hidden_pad):
    """One grid step == `batch_tile` (padded) batch elements.

    x_ref   : (TB, S, Hp)  bf16  input tile (H and B zero-padded in wrapper)
    wvs_ref : (Hp, 2*Hp)   bf16  fused RHS [ Wv^T | Wk^T @ Qrep / sqrt(d) ]
    bvs_ref : (1, 2*Hp)    f32   fused bias [ bv  | bk @ Qrep / sqrt(d) ]
    wo_t_ref: (Hp, Hp)     bf16  Wo^T (pre-transposed, zero-padded)
    bo_ref  : (1, Hp)      f32   bo (zero-padded)
    out_ref : (TB, Hp)     f32   pooled outputs (lane-dense 2-D block)
    """
    tb, S, Hp = batch_tile, seq_len, hidden_pad

    x = x_ref[...].reshape(tb * S, Hp)                       # bf16 (M, Hp)

    # One MXU matmul (bf16 operands, f32 accumulation) produces both the V
    # projection and the per-output-lane attention scores.  Score columns are
    # already replicated across each head's d lanes, so the softmax below IS
    # the per-head softmax and no head-expansion step is needed.
    vs = jnp.dot(x, wvs_ref[...], preferred_element_type=jnp.float32)
    vs = vs + bvs_ref[...]                                   # (M, 2*Hp) f32
    v = vs[:, :Hp].reshape(tb, S, Hp)                        # vreg-aligned slice
    scores = vs[:, Hp:].reshape(tb, S, Hp)                   # vreg-aligned slice

    # f32 softmax over the sequence axis (per batch element, per lane).
    m = jnp.max(scores, axis=1, keepdims=True)               # (TB, 1, Hp)
    e = jnp.exp(scores - m)
    denom = jnp.sum(e, axis=1, keepdims=True)                # (TB, 1, Hp)
    p = e * pl.reciprocal(denom, approx=True)                # (TB, S, Hp)

    # Attention-weighted sum of V over the sequence: VPU multiply + sublane
    # reduction.  This is exactly the concatenated multi-head output.
    o = jnp.sum(p * v, axis=1)                               # (TB, Hp) f32

    # Output projection (bf16 MXU operands, f32 accumulation).
    out = jnp.dot(o.astype(wo_t_ref.dtype), wo_t_ref[...],
                  preferred_element_type=jnp.float32) + bo_ref[...]
    out_ref[...] = out.astype(out_ref.dtype)


def _vmem_capacity_bytes():
    try:
        return int(pltpu.get_tpu_info().vmem_capacity_bytes)
    except Exception:
        return 128 << 20


def _choose_batch_tile(batch, seq_len, hidden_pad, vmem_cap):
    """Batch tile sized from the VMEM/DMA budget (not from MXU M-rows).

    * bf16 x tile targeted at ~2 MB (v7x-class, 64 MiB VMEM) or ~4 MB
      (v5e/v6e, 128 MiB): tiles >= ~1 MB sit near the HBM roofline, tiny
      tiles sit at ~30% of it.
    * per-step working set (double-buffered x/out tiles + f32 intermediates
      vs/scores/e/p/v) kept under ~1/2 of the VMEM capacity.
    * keep >= 2 grid steps so v7x can shard the parallel axis over its 2 TCs.
    """
    x_row = seq_len * hidden_pad * 2                          # bf16 bytes / batch row
    ws_row = 2 * x_row + 6 * seq_len * hidden_pad * 4 + 2 * hidden_pad * 4
    tile_target = (2 << 20) if vmem_cap <= (64 << 20) else (4 << 20)
    tb_dma = max(8, (tile_target // x_row) // 8 * 8)
    tb_vmem = max(8, ((vmem_cap // 2) // ws_row) // 8 * 8)
    tb_steps = max(8, _round_up(-(-batch // 2), 8))           # aim for >= 2 steps
    return min(tb_dma, tb_vmem, tb_steps)


def attention_pooling(x, params, *, num_heads):
    """x: (B, S, H) -> (B, H); matches AttentionPoolingLayer.forward
    (eval mode, attention_mask=None)."""
    B, S, H = x.shape
    assert H % num_heads == 0
    d = H // num_heads
    f32, bf16 = jnp.float32, jnp.bfloat16
    Hp = _round_up(H, 128)                       # lane-dense padding

    query = params["query"].astype(f32).reshape(1, H)
    wq = params["wq"].astype(f32)
    wk = params["wk"].astype(f32)
    wv = params["wv"].astype(f32)
    wo = params["wo"].astype(f32)
    bq = params["bq"].astype(f32).reshape(1, H)
    bk = params["bk"].astype(f32).reshape(H)
    bv = params["bv"].astype(f32).reshape(H)
    bo = params["bo"].astype(f32).reshape(H)

    # ---- Hoisted, batch-invariant precomputation (plain XLA, runs once) ----
    # q projection: an M=1 matmul does not belong on the kernel's MXU.
    q = (query @ wq.T + bq).reshape(H)                               # (H,)
    # Head-replicated scaled query Qrep (H, Hp): column j (output lane of head
    # j//d) carries q/sqrt(d) on its own head's input lanes, 0 elsewhere
    # (padded columns j >= H are all zero).  Folding Wk/bk into it removes
    # both Wq and Wk from the kernel and pre-broadcasts scores across lanes.
    in_head = jnp.arange(H) // d
    out_head = jnp.arange(Hp) // d
    same = (in_head[:, None] == out_head[None, :]) & (jnp.arange(Hp)[None, :] < H)
    qrep = jnp.where(same, (q / math.sqrt(d))[:, None], 0.0)         # (H, Hp)
    score_w = wk.T @ qrep                                            # (H, Hp)
    score_b = bk @ qrep                                              # (Hp,)

    # Zero-pad V / output projections to Hp lanes; fuse [Wv^T | score_w] into
    # one pre-transposed RHS.  bf16 weights + bf16 x -> 2x MXU throughput and
    # half the HBM/VMEM traffic; accumulation stays f32 inside the kernel.
    wv_t = jnp.pad(wv.T, ((0, Hp - H), (0, Hp - H)))
    wvs = jnp.concatenate(
        [wv_t, jnp.pad(score_w, ((0, Hp - H), (0, 0)))], axis=1).astype(bf16)
    bvs = jnp.concatenate([jnp.pad(bv, (0, Hp - H)), score_b])[None, :]   # f32
    wo_t = jnp.pad(wo.T, ((0, Hp - H), (0, Hp - H))).astype(bf16)
    bo_p = jnp.pad(bo, (0, Hp - H))[None, :]                              # f32

    # ---- Tiling: sized by VMEM/DMA budget, per-generation VMEM cap --------
    vmem_cap = _vmem_capacity_bytes()
    small_vmem = vmem_cap <= (64 << 20)          # v7x-class TensorCore
    tb = _choose_batch_tile(B, S, Hp, vmem_cap)
    Bp = max(_round_up(B, tb), 2 * tb)           # guarantee >= 2 grid steps
    steps = Bp // tb
    if small_vmem and steps % 2:                 # balance v7x's 2 TensorCores
        Bp += tb
        steps += 1

    x_p = jnp.pad(x, ((0, Bp - B), (0, 0), (0, Hp - H))).astype(bf16)

    # Explicit VMEM budget: double-buffered x/out tiles, weights (single- or
    # double-buffered), f32 intermediates, headroom; capped per generation
    # (leave ~8-13 MiB on v7x's 64 MiB, allow ~100 MiB on v5e/v6e's 128 MiB).
    weight_bytes = (wvs.size + wo_t.size) * 2 + (bvs.size + bo_p.size) * 4
    single_buffer_weights = weight_bytes > (4 << 20)
    wbuf = 1 if single_buffer_weights else 2
    x_tile = tb * S * Hp * 2
    out_tile = tb * Hp * 4
    interm = 6 * tb * S * Hp * 4
    cap = vmem_cap - max(8 << 20, vmem_cap // 5)
    est = 2 * (x_tile + out_tile) + wbuf * weight_bytes + interm + (8 << 20)
    vmem_limit = int(min(cap, max(est, 32 << 20)))

    kernel = functools.partial(_attn_pool_kernel, batch_tile=tb,
                               seq_len=S, hidden_pad=Hp)
    bcast2d = lambda b: (0, 0)   # weights / biases: same block every grid step
    # Grid-invariant weights: single-buffer them only when they are big enough
    # to matter for the VMEM budget (keeps the small-shape path on defaults).
    wkw = {"pipeline_mode": pl.Buffered(1)} if single_buffer_weights else {}

    out = pl.pallas_call(
        kernel,
        out_shape=jax.ShapeDtypeStruct((Bp, Hp), jnp.float32),
        grid_spec=pltpu.PrefetchScalarGridSpec(
            num_scalar_prefetch=0,
            grid=(steps,),
            in_specs=[
                pl.BlockSpec((tb, S, Hp), lambda b: (b, 0, 0)),        # x
                pl.BlockSpec((Hp, 2 * Hp), bcast2d, **wkw),            # [Wv^T|score_w]
                pl.BlockSpec((1, 2 * Hp), bcast2d, **wkw),             # fused bias
                pl.BlockSpec((Hp, Hp), bcast2d, **wkw),                # Wo^T
                pl.BlockSpec((1, Hp), bcast2d, **wkw),                 # bo
            ],
            out_specs=pl.BlockSpec((tb, Hp), lambda b: (b, 0)),
        ),
        compiler_params=pltpu.CompilerParams(
            dimension_semantics=("parallel",),
            vmem_limit_bytes=vmem_limit),
    )(x_p, wvs, bvs, wo_t, bo_p)

    # Strip batch / lane padding.
    return out[:B, :H].astype(x.dtype)


def _reference(x, params, *, num_heads):
    """Pure numpy reference of torch.nn.MultiheadAttention (eval, no mask)."""
    x = np.asarray(x, np.float32)
    B, S, H = x.shape
    d = H // num_heads
    q = np.asarray(params["query"]) @ np.asarray(params["wq"]).T + np.asarray(params["bq"])
    k = x @ np.asarray(params["wk"]).T + np.asarray(params["bk"])
    v = x @ np.asarray(params["wv"]).T + np.asarray(params["bv"])
    outs = []
    for b in range(B):
        heads = []
        for h in range(num_heads):
            sl = slice(h * d, (h + 1) * d)
            s = (q[:, sl] @ k[b, :, sl].T) / math.sqrt(d)          # (1, S)
            s = s - s.max(-1, keepdims=True)
            p = np.exp(s); p /= p.sum(-1, keepdims=True)
            heads.append(p @ v[b, :, sl])                           # (1, d)
        o = np.concatenate(heads, -1)                               # (1, H)
        outs.append(o @ np.asarray(params["wo"]).T + np.asarray(params["bo"]))
    return np.concatenate(outs, 0)                                  # (B, H)


def init_params(key, hidden_size):
    """Deterministic synthetic parameters (shapes match the PyTorch module)."""
    H = hidden_size
    ks = jax.random.split(key, 9)
    scale = 1.0 / math.sqrt(H)
    return {
        "query": jax.random.normal(ks[0], (1, H), jnp.float32),
        # in_proj_weight (3H, H) split into Wq/Wk/Wv; in_proj_bias likewise
        "wq": jax.random.normal(ks[1], (H, H), jnp.float32) * scale,
        "wk": jax.random.normal(ks[2], (H, H), jnp.float32) * scale,
        "wv": jax.random.normal(ks[3], (H, H), jnp.float32) * scale,
        "bq": jax.random.normal(ks[4], (H,), jnp.float32) * 0.1,
        "bk": jax.random.normal(ks[5], (H,), jnp.float32) * 0.1,
        "bv": jax.random.normal(ks[6], (H,), jnp.float32) * 0.1,
        "wo": jax.random.normal(ks[7], (H, H), jnp.float32) * scale,
        "bo": jax.random.normal(ks[8], (H,), jnp.float32) * 0.1,
    }


if __name__ == "__main__":
    B, S, H, NUM_HEADS = 2, 8, 32, 4

    key = jax.random.PRNGKey(0)
    k_x, k_p = jax.random.split(key)
    x = jax.random.normal(k_x, (B, S, H), jnp.float32)
    params = init_params(k_p, H)

    out = attention_pooling(x, params, num_heads=NUM_HEADS)
    out = jax.block_until_ready(out)

    ref = _reference(x, params, num_heads=NUM_HEADS)
    # Tolerance covers the bf16 MXU operands (x, fused weights, Wo^T), the
    # approximate EUP reciprocal in the softmax normalization, and the f32
    # reassociation from the folded/fused projections.
    np.testing.assert_allclose(np.asarray(out), ref, atol=2e-2, rtol=2e-2)
    assert out.shape == (B, H)

    print("KERNEL_OK")
</pallas_src>

<mosaic_0001>
module attributes {stable_mosaic.version = 11 : i64} {
  func.func @_attn_pool_kernel(%arg0: i32, %arg1: memref<8x8x128xbf16, #tpu.memory_space<vmem>>, %arg2: memref<128x256xbf16, #tpu.memory_space<vmem>>, %arg3: memref<1x256xf32, #tpu.memory_space<vmem>>, %arg4: memref<128x128xbf16, #tpu.memory_space<vmem>>, %arg5: memref<1x128xf32, #tpu.memory_space<vmem>>, %arg6: memref<8x128xf32, #tpu.memory_space<vmem>>) attributes {dimension_semantics = [#tpu.dimension_semantics<parallel>], iteration_bounds = array<i64: 2>, scalar_prefetch = 0 : i64, scratch_operands = 0 : i64, tpu.core_type = #tpu.core_type<tc>, window_params = [{transform_indices = @transform_0, window_bounds = array<i64: 8, 8, 128>}, {pipeline_mode = #tpu.pipeline_mode<synchronous>, transform_indices = @transform_1, window_bounds = array<i64: 128, 256>}, {pipeline_mode = #tpu.pipeline_mode<synchronous>, transform_indices = @transform_2, window_bounds = array<i64: 1, 256>}, {pipeline_mode = #tpu.pipeline_mode<synchronous>, transform_indices = @transform_3, window_bounds = array<i64: 128, 128>}, {pipeline_mode = #tpu.pipeline_mode<synchronous>, transform_indices = @transform_4, window_bounds = array<i64: 1, 128>}, {transform_indices = @transform_5, window_bounds = array<i64: 8, 128>}]} {
    %c0 = arith.constant 0 : index
    %c0_0 = arith.constant 0 : index
    %c0_1 = arith.constant 0 : index
    %0 = vector.load %arg1[%c0, %c0_0, %c0_1] : memref<8x8x128xbf16, #tpu.memory_space<vmem>>, vector<8x8x128xbf16>
    %1 = vector.shape_cast %0 : vector<8x8x128xbf16> to vector<64x128xbf16>
    %c0_2 = arith.constant 0 : index
    %c0_3 = arith.constant 0 : index
    %2 = vector.load %arg2[%c0_2, %c0_3] : memref<128x256xbf16, #tpu.memory_space<vmem>>, vector<128x256xbf16>
    %cst = arith.constant dense<0.000000e+00> : vector<64x256xf32>
    %3 = tpu.matmul %1, %2, %cst {dimension_numbers = #tpu.dot_dimension_numbers<[1], [0], [0], [1], [0, 0, 1, 1], [], []>} : vector<64x128xbf16>, vector<128x256xbf16>, vector<64x256xf32> -> vector<64x256xf32>
    %c0_4 = arith.constant 0 : index
    %c0_5 = arith.constant 0 : index
    %4 = vector.load %arg3[%c0_4, %c0_5] : memref<1x256xf32, #tpu.memory_space<vmem>>, vector<1x256xf32>
    %5 = vector.broadcast %4 : vector<1x256xf32> to vector<64x256xf32>
    %6 = arith.addf %3, %5 : vector<64x256xf32>
    %7 = vector.extract_strided_slice %6 {offsets = [0, 0], sizes = [64, 128], strides = [1, 1]} : vector<64x256xf32> to vector<64x128xf32>
    %8 = vector.shape_cast %7 : vector<64x128xf32> to vector<8x8x128xf32>
    %9 = vector.extract_strided_slice %6 {offsets = [0, 128], sizes = [64, 128], strides = [1, 1]} : vector<64x256xf32> to vector<64x128xf32>
    %10 = vector.shape_cast %9 : vector<64x128xf32> to vector<8x8x128xf32>
    %cst_6 = arith.constant dense<0xFF800000> : vector<8x128xf32>
    %11 = vector.multi_reduction <maximumf>, %10, %cst_6 [1] : vector<8x8x128xf32> to vector<8x128xf32>
    %12 = vector.shape_cast %11 : vector<8x128xf32> to vector<8x1x128xf32>
    %13 = vector.broadcast %12 : vector<8x1x128xf32> to vector<8x8x128xf32>
    %14 = arith.subf %10, %13 : vector<8x8x128xf32>
    %15 = math.exp %14 : vector<8x8x128xf32>
    %cst_7 = arith.constant dense<0.000000e+00> : vector<8x128xf32>
    %16 = vector.multi_reduction <add>, %15, %cst_7 [1] : vector<8x8x128xf32> to vector<8x128xf32>
    %17 = vector.shape_cast %16 : vector<8x128xf32> to vector<8x1x128xf32>
    %18 = tpu.reciprocal %17 {approx = true} : vector<8x1x128xf32> -> vector<8x1x128xf32>
    %19 = vector.broadcast %18 : vector<8x1x128xf32> to vector<8x8x128xf32>
    %20 = arith.mulf %15, %19 : vector<8x8x128xf32>
    %21 = arith.mulf %20, %8 : vector<8x8x128xf32>
    %cst_8 = arith.constant dense<0.000000e+00> : vector<8x128xf32>
    %22 = vector.multi_reduction <add>, %21, %cst_8 [1] : vector<8x8x128xf32> to vector<8x128xf32>
    %23 = arith.truncf %22 : vector<8x128xf32> to vector<8x128xbf16>
    %c0_9 = arith.constant 0 : index
    %c0_10 = arith.constant 0 : index
    %24 = vector.load %arg4[%c0_9, %c0_10] : memref<128x128xbf16, #tpu.memory_space<vmem>>, vector<128x128xbf16>
    %cst_11 = arith.constant dense<0.000000e+00> : vector<8x128xf32>
    %25 = tpu.matmul %23, %24, %cst_11 {dimension_numbers = #tpu.dot_dimension_numbers<[1], [0], [0], [1], [0, 0, 1, 1], [], []>} : vector<8x128xbf16>, vector<128x128xbf16>, vector<8x128xf32> -> vector<8x128xf32>
    %c0_12 = arith.constant 0 : index
    %c0_13 = arith.constant 0 : index
    %26 = vector.load %arg5[%c0_12, %c0_13] : memref<1x128xf32, #tpu.memory_space<vmem>>, vector<1x128xf32>
    %27 = vector.broadcast %26 : vector<1x128xf32> to vector<8x128xf32>
    %28 = arith.addf %25, %27 : vector<8x128xf32>
    %c0_14 = arith.constant 0 : index
    %c0_15 = arith.constant 0 : index
    %29 = vector.load %arg6[%c0_14, %c0_15] : memref<8x128xf32, #tpu.memory_space<vmem>>, vector<8x128xf32>
    tpu.vector_store %arg6[%c0_14, %c0_15], %28 {strides = array<i32>} : memref<8x128xf32, #tpu.memory_space<vmem>>, vector<8x128xf32>,
    return
  }
  func.func @transform_0(%arg0: i32) -> (i32, i32, i32) {
    %c0_i32 = arith.constant 0 : i32
    %c0_i32_0 = arith.constant 0 : i32
    %c0_i32_1 = arith.constant 0 : i32
    return %arg0, %c0_i32, %c0_i32_0 : i32, i32, i32
  }
  func.func @transform_1(%arg0: i32) -> (i32, i32) {
    %c0_i32 = arith.constant 0 : i32
    %c0_i32_0 = arith.constant 0 : i32
    %c0_i32_1 = arith.constant 0 : i32
    return %c0_i32, %c0_i32_0 : i32, i32
  }
  func.func @transform_2(%arg0: i32) -> (i32, i32) {
    %c0_i32 = arith.constant 0 : i32
    %c0_i32_0 = arith.constant 0 : i32
    %c0_i32_1 = arith.constant 0 : i32
    return %c0_i32, %c0_i32_0 : i32, i32
  }
  func.func @transform_3(%arg0: i32) -> (i32, i32) {
    %c0_i32 = arith.constant 0 : i32
    %c0_i32_0 = arith.constant 0 : i32
    %c0_i32_1 = arith.constant 0 : i32
    return %c0_i32, %c0_i32_0 : i32, i32
  }
  func.func @transform_4(%arg0: i32) -> (i32, i32) {
    %c0_i32 = arith.constant 0 : i32
    %c0_i32_0 = arith.constant 0 : i32
    %c0_i32_1 = arith.constant 0 : i32
    return %c0_i32, %c0_i32_0 : i32, i32
  }
  func.func @transform_5(%arg0: i32) -> (i32, i32) {
    %c0_i32 = arith.constant 0 : i32
    %c0_i32_0 = arith.constant 0 : i32
    return %arg0, %c0_i32 : i32, i32
  }
}

</mosaic_0001>

<bundles_post_ra>
// kernel: tpu_custom_call.1
= control target key start
LH: loop header
LB: loop body
LE: loop exit
PB: predicated region body
PF: predicated region fallthrough
CT: control target
= control target key end

     0   :  { %10 = vsyncpa [#allocation3], 0  ;;  %s1694_s0 = inlined_call_operand.hbm [shape: bf16[16,8,128], index: 0, kind: input, shape index: {}]   ;;  %s1695_s1 = inlined_call_operand.hbm [shape: bf16[128,256], index: 1, kind: input, shape index: {}]   ;;  %s1696_s2 = inlined_call_operand.vmem [shape: f32[1,256], index: 2, kind: input, shape index: {}]   ;;  %s1697_s3 = inlined_call_operand.hbm [shape: bf16[128,128], index: 3, kind: input, shape index: {}]   ;;  %s1698_s4 = inlined_call_operand.vmem [shape: f32[1,128], index: 4, kind: input, shape index: {}]   ;;  %s1699_s5 = inlined_call_operand.hbm [shape: f32[16,128], index: 5, kind: output, shape index: {}]  }
   0x1   :  { %12 = vsyncpa [#allocation3 + $0x1], 0 }
   0x2   :  { %13 = vsyncpa [#allocation6], 0 }
   0x3   :  { %14 = vsyncpa [#allocation4], 0 }
   0x4   :  { %16 = vsyncpa [#allocation4 + $0x1], 0  ;;  %s1351_s18 = smov 0   ;;  %s1353_s19 = smov 0  }
   0x5   :  { %s1355_s20 = smov 0   ;;  %s1357_s21 = smov 0  }
   0x6 LB: > { %s1372_s22 = sadd.s32 4294967295, %s1308_s21   ;;  %s934_s23 = sadd.s32 4294967294, %s1308_s21   ;;  %s1308_s21 = sphi %s1357_s21, %s1719_s21   ;;  %s1304_s20 = sphi %s1355_s20, %s1718_s20   ;;  %s1300_s19 = sphi %s1353_s19, %s1717_s19   ;;  %s1296_s18 = sphi %s1351_s18, %s1716_s18  }
   0x7   : > { %p42_p0 = scmp.ne.s32.totalorder %s1300_s19, %s1296_s18  ;;  %p1700_p1 = scmp.eq.s32.totalorder %s1372_s22, 0 }
   0x8   : > { %p156_p3 = scmp.eq.s32.totalorder %s934_s23, 1  ;;  %p935_p5 = scmp.ge.s32.totalorder %s1308_s21, 1 }
   0x9   : > { %p1381_p4 = por %p1700_p1, %p42_p0  ;;  %p163_p7 = scmp.lt.s32.totalorder %s1308_s21, 3 }
   0xa   : > { %p1386_p6 = por %p156_p3, %p42_p0  ;;  %s1310_s27 = smov [#allocation5]  }
   0xb   : > { %s1703_s24 = scalar_select %p1381_p4, 1, 0 }
   0xc   : > { %s1704_s25 = scalar_select %p1386_p6, 1, 0 }
   0xd   : > { %p1391_p8 = pnand %p935_p5, %p163_p7  ;;  %s175_s28 = sshll.u32 %s1310_s27, 4  ;;  %s1395_s28 = int_to_ptr.vmem [resolvable:$true] %s175_s28 }
   0xe   : > { %s1311_s30 = smov [#allocation7]   ;;  %s1152_s9 = scalar_lea.hbm %s1695_s1, 2048 }
   0xf   : > { %p1022_p9 = pneg %p1391_p8  ;;  %s191_s6 = sshll.u32 %s1311_s30, 4  ;;  %s1406_s6 = int_to_ptr.vmem [resolvable:$true] %s191_s6 }
  0x10   : > { %p1153_p12 = scmp.ne.s32.totalorder %s1695_s1, %s1152_s9  ;;  %p1159_p5 = scmp.lt.u32.totalorder %s1152_s9, %s1695_s1 }
  0x11   : > { %p1402_p11 = pnand %p1022_p9, %p1700_p1 }
  0x13   : > { %p1154_p13 = pneg %p1402_p11 }
  0x15   : > { %p1155_p0 = pnand %p1154_p13, %p1153_p12 }
  0x17   : > { %p1156_p3 = pneg %p1155_p0 }
  0x19   : > { %p1161_p7 = pnand %p1159_p5, %p1156_p3 }
  0x1b   : > { %1164 = shalt.err (!%p1161_p7)
}
  0x1c   : > { %s1165_s14 = scalar_lea.vmem %s1395_s28, 2048  ;;  %p1173_p2 = scmp.lt.s32.totalorder %s1395_s28, %s1395_s28 }
  0x1d   : > { %p1166_p9 = scmp.ne.s32.totalorder %s1395_s28, %s1165_s14  ;;  %p1174_p12 = scmp.lt.s32.totalorder %s1165_s14, %s1165_s14 }
  0x1f   : > { %p1168_p10 = pnand %p1166_p9, %p1154_p13  ;;  %p1175_p0 = por %p1174_p12, %p1173_p2 }
  0x21   : > { %p1169_p1 = pneg %p1168_p10 }
  0x23   : > { %p1176_p6 = pnand %p1175_p0, %p1169_p1 }
  0x25   : > { %1179 = shalt.err (!%p1176_p6)
}
  0x26   : > { %s1312_s15 = smov 128   ;;  %s1313_s16 = smov 8  }
  0x27   : > { %1025 = dma.hbm_to_vmem [thread:$0]  (!%p1402_p11), %s1695_s1, 2048, %s1395_s28, [#allocation6], %s1312_s15, %s1312_s15, %s1313_s16  }
  0x28   : > { %s1180_s7 = scalar_lea.hbm %s1697_s3, 1024 }
  0x29   : > { %p1181_p2 = scmp.ne.s32.totalorder %s1697_s3, %s1180_s7  ;;  %p1187_p10 = scmp.lt.u32.totalorder %s1180_s7, %s1697_s3 }
  0x2b   : > { %p1183_p1 = pnand %p1181_p2, %p1154_p13 }
  0x2d   : > { %p1184_p6 = pneg %p1183_p1 }
  0x2f   : > { %p1189_p3 = pnand %p1187_p10, %p1184_p6 }
  0x31   : > { %1192 = shalt.err (!%p1189_p3)
}
  0x32   : > { %s1193_s28 = scalar_lea.vmem %s1406_s6, 1024  ;;  %p1201_p12 = scmp.lt.s32.totalorder %s1406_s6, %s1406_s6 }
  0x33   : > { %p1194_p5 = scmp.ne.s32.totalorder %s1406_s6, %s1193_s28  ;;  %p1202_p0 = scmp.lt.s32.totalorder %s1193_s28, %s1193_s28 }
  0x35   : > { %p1196_p7 = pnand %p1194_p5, %p1154_p13  ;;  %p1203_p2 = por %p1202_p0, %p1201_p12 }
  0x37   : > { %p1197_p9 = pneg %p1196_p7 }
  0x39   : > { %p1204_p1 = pnand %p1203_p2, %p1197_p9 }
  0x3b   : > { %1207 = shalt.err (!%p1204_p1)
}
  0x3c   : > { %s1314_s12 = smov 64   ;;  %s1315_s13 = smov 4  }
  0x3d   : > { %1028 = dma.hbm_to_vmem [thread:$0]  (!%p1402_p11), %s1697_s3, 1024, %s1406_s6, [#allocation6], %s1314_s12, %s1314_s12, %s1315_s13  }
  0x3e   : > { %s1464_s16 = sadd.s32 1, %s1308_s21   ;;  %s29_s23 = sadd.s32 1, %s1304_s20 }
  0x3f   : > { %s26_s17 = ssub.s32 %s1308_s21, %s1464_s16  ;;  %p36_p6 = scmp.ne.s32.totalorder %s1304_s20, %s1300_s19 }
  0x40   : > { %p27_p13 = scmp.eq.s32.totalorder %s26_s17, 0  ;;  %p37_p10 = scmp.eq.s32.totalorder %s1308_s21, 0 }
  0x41   : > { %p1707_p5 = scmp.eq.s32.totalorder %s1372_s22, 1  ;;  %p1039_p9 = scmp.lt.s32.totalorder %s1308_s21, 2 }
  0x42   : > { %s1473_s27 = scalar_select %p27_p13, %s1304_s20, %s29_s23  }
  0x43   : > { %p38_p3 = por %p37_p10, %p36_p6  ;;  %p1477_p7 = por %p1707_p5, %p36_p6 }
  0x44   : > { %s208_s30 = sand.u32 1, %s1304_s20   ;;  %s980_s6 = sshll.u32 %s1308_s21, 9 }
  0x45   : > { %s1708_s29 = scalar_select %p1477_p7, 1, 0 }
  0x46   : > { %s939_s7 = sshll.u32 %s208_s30, 5  ;;  %s1487_s10 = scalar_lea.hbm %s1694_s0, %s980_s6 }
  0x47   : > { %s212_s11 = scalar_lea.vmem [#allocation2], %s939_s7  ;;  %p1491_p11 = pnand %p1039_p9, %p38_p3 }
  0x48   : > { %s219_s28 = sshll.u32 %s212_s11, 4  ;;  %s1495_s15 = scalar_lea.sflag [#allocation3], %s208_s30  ;;  %s1489_s28 = int_to_ptr.vmem [resolvable:$true] %s219_s28 }
  0x49   : > { %s1208_s17 = scalar_lea.hbm %s1487_s10, 512  ;;  %p1210_p0 = pneg %p1491_p11 }
  0x4a   : > { %p1209_p12 = scmp.ne.s32.totalorder %s1487_s10, %s1208_s17  ;;  %s1213_s6 = scalar_lea.hbm %s1694_s0, 1024 }
  0x4b   : > { %p1214_p13 = scmp.lt.u32.totalorder %s1487_s10, %s1694_s0  ;;  %p1215_p6 = scmp.lt.u32.totalorder %s1213_s6, %s1208_s17 }
  0x4c   : > { %p1211_p2 = pnand %p1210_p0, %p1209_p12  ;;  %p1217_p3 = scmp.lt.u32.totalorder %s1208_s17, %s1487_s10 }
  0x4d   : > { %p1216_p10 = por %p1215_p6, %p1214_p13 }
  0x4e   : > { %p1212_p1 = pneg %p1211_p2 }
  0x4f   : > { %p1218_p5 = por %p1217_p3, %p1216_p10 }
  0x51   : > { %p1219_p9 = pnand %p1218_p5, %p1212_p1 }
  0x53   : > { %1222 = shalt.err (!%p1219_p9)
}
  0x54   : > { %s1223_s30 = scalar_lea.vmem %s1489_s28, 512  ;;  %s1316_s11 = smov [#allocation2]  }
  0x55   : > { %p1224_p12 = scmp.ne.s32.totalorder %s1489_s28, %s1223_s30  ;;  %s1228_s23 = sshll.u32 %s1316_s11, 4  ;;  %s1229_s23 = int_to_ptr.vmem [resolvable:$false] %s1228_s23 }
  0x56   : > { %s1230_s7 = scalar_lea.vmem %s1229_s23, 1024  ;;  %p1231_p4 = scmp.lt.s32.totalorder %s1489_s28, %s1229_s23 }
  0x57   : > { %p1226_p2 = pnand %p1224_p12, %p1210_p0  ;;  %p1232_p13 = scmp.lt.s32.totalorder %s1230_s7, %s1223_s30 }
  0x59   : > { %p1227_p7 = pneg %p1226_p2  ;;  %p1233_p6 = por %p1232_p13, %p1231_p4 }
  0x5b   : > { %p1234_p10 = pnand %p1233_p6, %p1227_p7 }
  0x5d   : > { %1237 = shalt.err (!%p1234_p10)
}
  0x5e   : > { %1032 = dma.hbm_to_vmem [thread:$0]  (!%p1491_p11), %s1487_s10, 512, %s1489_s28, %s1495_s15, %s1314_s12, %s1314_s12, %s1315_s13  }
  0x5f   : > { %231 = sbr.rel (%p1391_p8) target bundleno = 681 (0x2a9), region = 40  ;;  %s1529_s17 = sand.u32 (!%p1391_p8), 1, %s1300_s19  }
  0x60   : > { %s943_s6 = sshll.u32 (!%p1391_p8), %s1529_s17, 5  ;;  %s234_s8 = scalar_lea.sflag (!%p1391_p8), [#allocation3], %s1529_s17 }
  0x61   : > { %s1533_s9 = scalar_lea.vmem (!%p1391_p8), [#allocation2], %s943_s6  ;;  %p1710_p4 = scmp.ne.s32.totalorder (!%p1391_p8), %s1703_s24, 0 }
  0x66   : > { %1283 = dma.done.wait (%p1710_p4), %s234_s8, 512  }
  0x67   : > { %1285 = vsyncadd (%p1710_p4), %s234_s8, 4294966784  ;;  %p1711_p7 = scmp.eq.s32.totalorder %s1372_s22, 0 }
  0x69   : > { %1287 = dma.done.wait (%p1711_p7), [#allocation6], 3072   ;;  %p1712_p8 = pmov %p1711_p7 }
  0x6a   : > { %v1317_v0 = vmov 0   ;;  %v1084_v1 = vld [vmem:[#allocation5 + $0x4] ss:$8 sps:$4 sm:$0xff]   ;;  %v1086_v2 = vld [vmem:[#allocation5] ss:$8 sps:$4 sm:$0xff]   ;;  %v1110_v19 = vld [vmem:[%s1533_s9 + $0x10] sm:$0xff]   ;;  %v300_v30 = vlaneseq }
  0x6b   : > { %1289 = vsyncadd (%p1712_p8), [#allocation6], 4294964224  ;;  %446 = vmatprep.mubr.bf16.mxu0 %v1317_v0  ;;  %414 = vmatprep.subr.bf16.mxu0 %v1084_v1  ;;  %v1087_v3 = vld [vmem:[#allocation5 + $0x14] ss:$8 sps:$4 sm:$0xff]   ;;  %v1089_v4 = vld [vmem:[#allocation5 + $0x10] ss:$8 sps:$4 sm:$0xff]  }
  0x6c   : > { %415 = vmatpush1.bf16.msra.mxu0 %v1086_v2  ;;  %v1090_v5 = vld [vmem:[#allocation5 + $0x24] ss:$8 sps:$4 sm:$0xff]   ;;  %v1092_v6 = vld [vmem:[#allocation5 + $0x20] ss:$8 sps:$4 sm:$0xff]   ;;  %v1093_v7 = vld [vmem:[#allocation5 + $0x34] ss:$8 sps:$4 sm:$0xff]  }
  0x6d   : > { %416 = vmatprep.subr.bf16.mxu0 %v1087_v3  ;;  %v1095_v8 = vld [vmem:[#allocation5 + $0x30] ss:$8 sps:$4 sm:$0xff]   ;;  %v1096_v9 = vld [vmem:[#allocation5 + $0x44] ss:$8 sps:$4 sm:$0xff]   ;;  %v1098_v10 = vld [vmem:[#allocation5 + $0x40] ss:$8 sps:$4 sm:$0xff]  }
  0x6e   : > { %v1099_v11 = vld [vmem:[#allocation5 + $0x54] ss:$8 sps:$4 sm:$0xff]   ;;  %v1101_v12 = vld [vmem:[#allocation5 + $0x50] ss:$8 sps:$4 sm:$0xff]   ;;  %v1102_v13 = vld [vmem:[#allocation5 + $0x64] ss:$8 sps:$4 sm:$0xff]  }
  0x6f   : > { %v1104_v14 = vld [vmem:[#allocation5 + $0x60] ss:$8 sps:$4 sm:$0xff]   ;;  %v1105_v15 = vld [vmem:[#allocation5 + $0x74] ss:$8 sps:$4 sm:$0xff]   ;;  %v1107_v16 = vld [vmem:[#allocation5 + $0x70] ss:$8 sps:$4 sm:$0xff]  }
  0x70   : > { %417 = vmatpush1.bf16.msra.mxu0 %v1089_v4  ;;  %v1108_v17 = vld [vmem:[%s1533_s9] sm:$0xff]   ;;  %v1109_v18 = vld [vmem:[%s1533_s9 + $0x8] sm:$0xff]   ;;  %v1111_v20 = vld [vmem:[%s1533_s9 + $0x18] sm:$0xff]   ;;  %v1318_v22 = vmov 0.0   ;;  %vm1319_vm0 = vmmov 0   ;;  %v1547_v31 = vshrl.u32 %v300_v30, 7 }
  0x71   : > { %418 = vmatprep.subr.bf16.mxu0 %v1090_v5  ;;  %v1112_v21 = vld [vmem:[#allocation7] sm:$0xff]   ;;  %990 = vmatprep.subr.bf16.mxu1 %v1318_v22  ;;  %v1113_v23 = vld [vmem:[#allocation7 + $0x8] sm:$0xff]   ;;  %v1114_v24 = vld [vmem:[#allocation7 + $0x10] sm:$0xff]   ;;  %vm726_vm1 = vcmask 1041409   ;;  %vm728_vm2 = vcmask 1042434   ;;  %vm730_vm3 = vcmask 1043459  }
  0x72   : > { %1006 = vmatprep.mubr.msk.bf16.mxu1 %vm1319_vm0, %v1318_v22  ;;  %991 = vmatpush3.bf16.msra.mxu1 %v1112_v21  ;;  %v1115_v25 = vld [vmem:[#allocation7 + $0x18] sm:$0xff]   ;;  %v1116_v26 = vld [vmem:[#allocation7 + $0x20] sm:$0xff]   ;;  %v1117_v27 = vld [vmem:[#allocation7 + $0x28] sm:$0xff]   ;;  %v306_v32 = vsub.s32 1, %v1547_v31  ;;  %vm732_vm4 = vcmask 1044484   ;;  %vm734_vm5 = vcmask 1045509  }
  0x73   : > { %992 = vmatprep.subr.bf16.mxu1 %v1318_v22  ;;  %v1118_v28 = vld [vmem:[#allocation7 + $0x30] sm:$0xff]   ;;  %v1119_v29 = vld [vmem:[#allocation7 + $0x38] sm:$0xff]   ;;  %v1553_v33 = vld [vmem:[%s1696_s2] sm:$0x3]  ;;  %vm736_vm6 = vcmask 1046534   ;;  %vm738_vm7 = vcmask 1047559  }
  0x74   : > { %419 = vmatpush1.bf16.msra.mxu0 %v1092_v6  ;;  %v1556_v34 = vrot.slane %v1553_v33, %v306_v32  ;;  %s946_s12 = sshll.u32 %s1529_s17, 3  ;;  %s977_s28 = sshll.u32 %s1372_s22, 7 }
  0x75   : > { %420 = vmatprep.subr.bf16.mxu0 %v1093_v7  ;;  %s271_s14 = scalar_lea.vmem [#allocation8], %s946_s12  ;;  %s1650_s23 = scalar_lea.hbm %s1699_s5, %s977_s28 }
  0x76   : > { %993 = vmatpush3.bf16.msra.mxu1 %v1113_v23  ;;  %s845_s15 = sshll.u32 %s271_s14, 4  ;;  %s832_s7 = scalar_lea.sflag [#allocation4], %s1529_s17  ;;  %s1652_s15 = int_to_ptr.vmem [resolvable:$true] %s845_s15 }
  0x77   : > { %994 = vmatprep.subr.bf16.mxu1 %v1318_v22  ;;  %s1238_s22 = scalar_lea.vmem %s1652_s15, 128  ;;  %p1713_p0 = scmp.ne.s32.totalorder %s1708_s29, 0 }
  0x78   : > { %421 = vmatpush1.bf16.msra.mxu0 %v1095_v8  ;;  %p1239_p11 = scmp.ne.s32.totalorder %s1652_s15, %s1238_s22  ;;  %s1320_s6 = smov [#allocation8]  }
  0x79   : > { %422 = vmatprep.subr.bf16.mxu0 %v1096_v9  ;;  %s1242_s8 = sshll.u32 %s1320_s6, 4  ;;  %s1243_s8 = int_to_ptr.vmem [resolvable:$false] %s1242_s8 }
  0x7a   : > { %995 = vmatpush3.bf16.msra.mxu1 %v1114_v24  ;;  %p1240_p1 = pnand %p1239_p11, %p1713_p0  ;;  %s1244_s9 = scalar_lea.vmem %s1243_s8, 256 }
  0x7b   : > { %996 = vmatprep.subr.bf16.mxu1 %v1318_v22  ;;  %p1245_p5 = scmp.lt.s32.totalorder %s1652_s15, %s1243_s8  ;;  %p1246_p9 = scmp.lt.s32.totalorder %s1244_s9, %s1238_s22 }
  0x7c   : > { %423 = vmatpush1.bf16.msra.mxu0 %v1098_v10  ;;  %p1241_p3 = pneg %p1240_p1 }
  0x7d   : > { %424 = vmatprep.subr.bf16.mxu0 %v1099_v11  ;;  %p1247_p12 = por %p1246_p9, %p1245_p5 }
  0x7e   : > { %997 = vmatpush3.bf16.msra.mxu1 %v1115_v25 }
  0x7f   : > { %998 = vmatprep.subr.bf16.mxu1 %v1318_v22  ;;  %p1248_p2 = pnand %p1247_p12, %p1241_p3 }
  0x80   : > { %425 = vmatpush1.bf16.msra.mxu0 %v1101_v12 }
  0x81   : > { %426 = vmatprep.subr.bf16.mxu0 %v1102_v13 }
  0x82   : > { %999 = vmatpush3.bf16.msra.mxu1 %v1116_v26 }
  0x83   : > { %1000 = vmatprep.subr.bf16.mxu1 %v1318_v22 }
  0x84   : > { %427 = vmatpush1.bf16.msra.mxu0 %v1104_v14 }
  0x85   : > { %428 = vmatprep.subr.bf16.mxu0 %v1105_v15 }
  0x86   : > { %1001 = vmatpush3.bf16.msra.mxu1 %v1117_v27 }
  0x87   : > { %1002 = vmatprep.subr.bf16.mxu1 %v1318_v22 }
  0x88   : > { %429 = vmatpush1.bf16.msra.mxu0 %v1107_v16 }
  0x8a   : > { %1003 = vmatpush3.bf16.msra.mxu1 %v1118_v28 }
  0x8b   : > { %447 = vmatmul.mubr.bf16.vlgmr.msra.gmra.mrb[0].mxu0 %v1108_v17  ;;  %1004 = vmatprep.subr.bf16.mxu1 %v1318_v22 }
  0x8c   : > { %456 = vmatprep.mubr.bf16.mxu0 %v1317_v0 }
  0x8e   : > { %1005 = vmatpush3.bf16.msra.mxu1 %v1119_v29 }
  0x93   : > { %457 = vmatmul.mubr.bf16.gmra.mrb[4].mxu0 %v1109_v18 }
  0x94   : > { %466 = vmatprep.mubr.bf16.mxu0 %v1317_v0 }
  0x9b   : > { %467 = vmatmul.mubr.bf16.gmra.mrb[8].mxu0 %v1110_v19 }
  0x9c   : > { %476 = vmatprep.mubr.bf16.mxu0 %v1317_v0 }
  0xa3   : > { %477 = vmatmul.mubr.bf16.gmra.mrb[12].mxu0 %v1111_v20 }
 0x15e   : > { %v1558_v35 = vpop.f32.mrb[0].mxu0 }
 0x15f   : > { %v450_v36 = vpop.f32.mrb[1].mxu0 }
 0x160   : > { %v451_v37 = vadd.f32 %v450_v36, %v1556_v34  ;;  %v1561_v38 = vpop.f32.mrb[2].mxu0 }
 0x161   : > { %v454_v39 = vpop.f32.mrb[3].mxu0 }
 0x162   : > { %v487_v40 = vrot.slane %v451_v37, 4  ;;  %v455_v41 = vadd.f32 %v454_v39, %v1556_v34 }
 0x164   : > { %v488_v42 = vmax.f32 %v451_v37, %v487_v40  ;;  %v493_v43 = vrot.slane %v455_v41, 4 }
 0x166   : > { %v489_v44 = vrot.slane %v488_v42, 2  ;;  %v494_v45 = vmax.f32 %v455_v41, %v493_v43  ;;  %v1564_v46 = vpop.f32.mrb[4].mxu0 }
 0x167   : > { %v460_v47 = vpop.f32.mrb[5].mxu0 }
 0x168   : > { %v490_v48 = vmax.f32 %v488_v42, %v489_v44  ;;  %v495_v49 = vrot.slane %v494_v45, 2  ;;  %v461_v50 = vadd.f32 %v460_v47, %v1556_v34  ;;  %v1567_v51 = vpop.f32.mrb[6].mxu0 }
 0x169   : > { %v464_v52 = vpop.f32.mrb[7].mxu0 }
 0x16a   : > { %v491_v53 = vrot.slane %v490_v48, 1  ;;  %v496_v54 = vmax.f32 %v494_v45, %v495_v49  ;;  %v499_v55 = vrot.slane %v461_v50, 4  ;;  %v465_v56 = vadd.f32 %v464_v52, %v1556_v34 }
 0x16c   : > { %v492_v57 = vmax.f32 %v490_v48, %v491_v53  ;;  %v497_v58 = vrot.slane %v496_v54, 1  ;;  %v500_v59 = vmax.f32 %v461_v50, %v499_v55  ;;  %v505_v60 = vrot.slane %v465_v56, 4 }
 0x16e   : > { %v535_v61 = vsub.f32 %v451_v37, %v492_v57  ;;  %v498_v62 = vmax.f32 %v496_v54, %v497_v58  ;;  %v501_v63 = vrot.slane %v500_v59, 2  ;;  %v506_v0 = vmax.f32 %v465_v56, %v505_v60  ;;  %v1570_v1 = vpop.f32.mrb[8].mxu0 }
 0x16f   : > { %v470_v2 = vpop.f32.mrb[9].mxu0 }
 0x170   : > { %v543_v3 = vmul.f32 1.442695, %v535_v61  ;;  %v536_v4 = vsub.f32 %v455_v41, %v498_v62  ;;  %v502_v5 = vmax.f32 %v500_v59, %v501_v63  ;;  %v507_v6 = vrot.slane %v506_v0, 2  ;;  %v1572_v7 = vpop.f32.mrb[10].mxu0 }
 0x171   : > { %v471_v8 = vadd.f32 %v470_v2, %v1556_v34  ;;  %v474_v9 = vpop.f32.mrb[11].mxu0 }
 0x172   : > { %1120 = vpow2.f32 %v543_v3  ;;  %v545_v10 = vmul.f32 1.442695, %v536_v4  ;;  %v503_v11 = vrot.slane %v502_v5, 1  ;;  %v508_v12 = vmax.f32 %v506_v0, %v507_v6 }
 0x173   : > { %v511_v13 = vrot.slane %v471_v8, 4  ;;  %v475_v14 = vadd.f32 %v474_v9, %v1556_v34 }
 0x174   : > { %1122 = vpow2.f32 %v545_v10  ;;  %v504_v15 = vmax.f32 %v502_v5, %v503_v11  ;;  %v509_v16 = vrot.slane %v508_v12, 1 }
 0x175   : > { %v512_v17 = vmax.f32 %v471_v8, %v511_v13  ;;  %v517_v18 = vrot.slane %v475_v14, 4 }
 0x176   : > { %v537_v19 = vsub.f32 %v461_v50, %v504_v15  ;;  %v510_v20 = vmax.f32 %v508_v12, %v509_v16  ;;  %v1576_v21 = vpop.f32.mrb[12].mxu0 }
 0x177   : > { %v513_v22 = vrot.slane %v512_v17, 2  ;;  %v518_v23 = vmax.f32 %v475_v14, %v517_v18  ;;  %v480_v24 = vpop.f32.mrb[13].mxu0 }
 0x178   : > { %v547_v25 = vmul.f32 1.442695, %v537_v19  ;;  %v538_v26 = vsub.f32 %v465_v56, %v510_v20  ;;  %v481_v27 = vadd.f32 %v480_v24, %v1556_v34  ;;  %v1579_v28 = vpop.f32.mrb[14].mxu0 }
 0x179   : > { %v514_v29 = vmax.f32 %v512_v17, %v513_v22  ;;  %v519_v30 = vrot.slane %v518_v23, 2  ;;  %v484_v32 = vpop.f32.mrb[15].mxu0 }
 0x17a   : > { %1124 = vpow2.f32 %v547_v25  ;;  %v549_v36 = vmul.f32 1.442695, %v538_v26  ;;  %v523_v37 = vrot.slane %v481_v27, 4  ;;  %v485_v39 = vadd.f32 %v484_v32, %v1556_v34 }
 0x17b   : > { %v515_v40 = vrot.slane %v514_v29, 1  ;;  %v520_v41 = vmax.f32 %v518_v23, %v519_v30 }
 0x17c   : > { %v1582_v42 = vpop.eup %1120  ;;  %1126 = vpow2.f32 %v549_v36  ;;  %v524_v43 = vmax.f32 %v481_v27, %v523_v37  ;;  %v529_v44 = vrot.slane %v485_v39, 4 }
 0x17d   : > { %v559_v45 = vrot.slane %v1582_v42, 4  ;;  %v516_v47 = vmax.f32 %v514_v29, %v515_v40  ;;  %v521_v48 = vrot.slane %v520_v41, 1 }
 0x17e   : > { %v1585_v49 = vpop.eup %1122  ;;  %v525_v50 = vrot.slane %v524_v43, 2  ;;  %v530_v52 = vmax.f32 %v485_v39, %v529_v44 }
 0x17f   : > { %v560_v53 = vadd.f32 %v1582_v42, %v559_v45  ;;  %v565_v54 = vrot.slane %v1585_v49, 4  ;;  %v539_v34 = vsub.f32 %v471_v8, %v516_v47  ;;  %v522_v55 = vmax.f32 %v520_v41, %v521_v48 }
 0x180   : > { %v526_v56 = vmax.f32 %v524_v43, %v525_v50  ;;  %v531_v57 = vrot.slane %v530_v52, 2 }
 0x181   : > { %v561_v58 = vrot.slane %v560_v53, 2  ;;  %v566_v59 = vadd.f32 %v1585_v49, %v565_v54  ;;  %v551_v60 = vmul.f32 1.442695, %v539_v34  ;;  %v540_v61 = vsub.f32 %v475_v14, %v522_v55 }
 0x182   : > { %v527_v62 = vrot.slane %v526_v56, 1  ;;  %v532_v63 = vmax.f32 %v530_v52, %v531_v57 }
 0x183   : > { %v562_v0 = vadd.f32 %v561_v58, %v560_v53  ;;  %v567_v2 = vrot.slane %v566_v59, 2  ;;  %1128 = vpow2.f32 %v551_v60  ;;  %v553_v3 = vmul.f32 1.442695, %v540_v61 }
 0x184   : > { %v1590_v4 = vpop.eup %1124  ;;  %v528_v5 = vmax.f32 %v526_v56, %v527_v62  ;;  %v533_v6 = vrot.slane %v532_v63, 1 }
 0x185   : > { %v563_v9 = vrot.slane %v562_v0, 1  ;;  %v568_v8 = vadd.f32 %v567_v2, %v566_v59  ;;  %v571_v10 = vrot.slane %v1590_v4, 4  ;;  %1130 = vpow2.f32 %v553_v3 }
 0x186   : > { %v1593_v11 = vpop.eup %1126  ;;  %v541_v12 = vsub.f32 %v481_v27, %v528_v5  ;;  %v534_v13 = vmax.f32 %v532_v63, %v533_v6  ;;  %v302_v27 = vsub.s32 0, %v1547_v31 }
 0x187   : > { %v564_v14 = vadd.f32 %v563_v9, %v562_v0  ;;  %v569_v15 = vrot.slane %v568_v8, 1  ;;  %v572_v16 = vadd.f32 %v1590_v4, %v571_v10  ;;  %v577_v17 = vrot.slane %v1593_v11, 4 }
 0x188   : > { %v555_v18 = vmul.f32 1.442695, %v541_v12  ;;  %v542_v19 = vsub.f32 %v485_v39, %v534_v13  ;;  %v1605_v41 = vrot.slane %v1553_v33, %v302_v27 }
 0x189   : > { %1132 = vrcp.f32 %v564_v14  ;;  %v570_v20 = vadd.f32 %v569_v15, %v568_v8  ;;  %v573_v22 = vrot.slane %v572_v16, 2  ;;  %v578_v23 = vadd.f32 %v1593_v11, %v577_v17 }
 0x18a   : > { %1134 = vpow2.f32 %v555_v18  ;;  %v557_v24 = vmul.f32 1.442695, %v542_v19  ;;  %v449_v52 = vadd.f32 %v1558_v35, %v1605_v41  ;;  %v453_v55 = vadd.f32 %v1561_v38, %v1605_v41 }
 0x18b   : > { %1136 = vrcp.f32 %v570_v20  ;;  %v574_v25 = vadd.f32 %v573_v22, %v572_v16  ;;  %v579_v26 = vrot.slane %v578_v23, 2  ;;  %v463_v17 = vadd.f32 %v1567_v51, %v1605_v41 }
 0x18c   : > { %1138 = vpow2.f32 %v557_v24 }
 0x18d   : > { %v1599_v29 = vpop.eup %1128  ;;  %v575_v30 = vrot.slane %v574_v25, 1  ;;  %v580_v32 = vadd.f32 %v579_v26, %v578_v23 }
 0x18e   : > { %v583_v36 = vrot.slane %v1599_v29, 4 }
 0x18f   : > { %v1602_v37 = vpop.eup %1130  ;;  %v576_v39 = vadd.f32 %v575_v30, %v574_v25  ;;  %v581_v40 = vrot.slane %v580_v32, 1 }
 0x190   : > { %v584_v43 = vadd.f32 %v1599_v29, %v583_v36  ;;  %v589_v44 = vrot.slane %v1602_v37, 4 }
 0x191   : > { %1140 = vrcp.f32 %v576_v39  ;;  %v582_v31 = vadd.f32 %v581_v40, %v580_v32 }
 0x192   : > { %v585_v45 = vrot.slane %v584_v43, 2  ;;  %v590_v47 = vadd.f32 %v1602_v37, %v589_v44 }
 0x193   : > { %v1133_v48 = vpop.eup %1132  ;;  %1142 = vrcp.f32 %v582_v31 }
 0x194   : > { %v1610_v50 = vpop.eup %1134  ;;  %v615_v53 = vmul.f32 %v1133_v48, %v1582_v42  ;;  %v586_v33 = vadd.f32 %v585_v45, %v584_v43  ;;  %v591_v54 = vrot.slane %v590_v47, 2 }
 0x195   : > { %v1137_v34 = vpop.eup %1136  ;;  %v595_v56 = vrot.slane %v1610_v50, 4 }
 0x196   : > { %v1618_v57 = vpop.eup %1138  ;;  %v616_v58 = vmul.f32 %v1137_v34, %v1585_v49  ;;  %v587_v59 = vrot.slane %v586_v33, 1  ;;  %v592_v60 = vadd.f32 %v591_v54, %v590_v47  ;;  %v623_v61 = vmul.f32 %v615_v53, %v449_v52 }
 0x197   : > { %v596_v62 = vadd.f32 %v1610_v50, %v595_v56  ;;  %v601_v35 = vrot.slane %v1618_v57, 4  ;;  %v459_v49 = vadd.f32 %v1564_v46, %v1605_v41  ;;  %v469_v47 = vadd.f32 %v1570_v1, %v1605_v41 }
 0x198   : > { %v588_v42 = vadd.f32 %v587_v59, %v586_v33  ;;  %v593_v63 = vrot.slane %v592_v60, 1  ;;  %v624_v0 = vmul.f32 %v616_v58, %v453_v55  ;;  %v631_v2 = vrot.slane %v623_v61, 4 }
 0x199   : > { %v597_v3 = vrot.slane %v596_v62, 2  ;;  %v602_v38 = vadd.f32 %v1618_v57, %v601_v35  ;;  %v473_v34 = vadd.f32 %v1572_v7, %v1605_v41 }
 0x19a   : > { %1144 = vrcp.f32 %v588_v42  ;;  %v594_v5 = vadd.f32 %v593_v63, %v592_v60  ;;  %v632_v6 = vadd.f32 %v631_v2, %v623_v61  ;;  %v637_v9 = vrot.slane %v624_v0, 4 }
 0x19b   : > { %v1141_v8 = vpop.eup %1140  ;;  %v598_v10 = vadd.f32 %v597_v3, %v596_v62  ;;  %v603_v12 = vrot.slane %v602_v38, 2  ;;  %v479_v3 = vadd.f32 %v1576_v21, %v1605_v41 }
 0x19c   : > { %1146 = vrcp.f32 %v594_v5  ;;  %v617_v13 = vmul.f32 %v1141_v8, %v1590_v4  ;;  %v633_v14 = vrot.slane %v632_v6, 2  ;;  %v638_v15 = vadd.f32 %v637_v9, %v624_v0 }
 0x19d   : > { %v1143_v16 = vpop.eup %1142  ;;  %v599_v18 = vrot.slane %v598_v10, 1  ;;  %v604_v19 = vadd.f32 %v603_v12, %v602_v38 }
 0x19e   : > { %v618_v20 = vmul.f32 %v1143_v16, %v1593_v11  ;;  %v625_v22 = vmul.f32 %v617_v13, %v459_v49  ;;  %v634_v23 = vadd.f32 %v633_v14, %v632_v6  ;;  %v639_v24 = vrot.slane %v638_v15, 2 }
 0x19f   : > { %v600_v25 = vadd.f32 %v599_v18, %v598_v10  ;;  %v605_v46 = vrot.slane %v604_v19, 1  ;;  %v483_v6 = vadd.f32 %v1579_v28, %v1605_v41 }
 0x1a0   : > { %v626_v26 = vmul.f32 %v618_v20, %v463_v17  ;;  %v635_v27 = vrot.slane %v634_v23, 1  ;;  %v640_v30 = vadd.f32 %v639_v24, %v638_v15  ;;  %v643_v32 = vrot.slane %v625_v22, 4 }
 0x1a1   : > { %v606_v4 = vadd.f32 %v605_v46, %v604_v19  ;;  %1148 = vrcp.f32 %v600_v25 }
 0x1a2   : > { %v636_v36 = vadd.f32 %v635_v27, %v634_v23  ;;  %v641_v39 = vrot.slane %v640_v30, 1  ;;  %v644_v40 = vadd.f32 %v643_v32, %v625_v22  ;;  %v649_v43 = vrot.slane %v626_v26, 4 }
 0x1a3   : > { %1150 = vrcp.f32 %v606_v4 }
 0x1a4   : > { %v1145_v51 = vpop.eup %1144  ;;  %v642_v44 = vadd.f32 %v641_v39, %v640_v30  ;;  %v645_v31 = vrot.slane %v644_v40, 2  ;;  %v650_v11 = vadd.f32 %v649_v43, %v626_v26  ;;  %v679_v45 = vpack.c.bf16 %v636_v36, %v636_v36 }
 0x1a5   : > { %v619_v48 = vmul.f32 %v1145_v51, %v1599_v29 }
 0x1a6   : > { %v1147_v52 = vpop.eup %1146  ;;  %v646_v53 = vadd.f32 %v645_v31, %v644_v40  ;;  %v651_v33 = vrot.slane %v650_v11, 2  ;;  %v680_v54 = vpack.c.bf16 %v642_v44, %v642_v44  ;;  %v718_v60 = vunpack.c.l.b16 %v679_v45 }
 0x1a7   : > { %v620_v55 = vmul.f32 %v1147_v52, %v1602_v37  ;;  %v627_v56 = vmul.f32 %v619_v48, %v469_v47 }
 0x1a8   : > { %v647_v58 = vrot.slane %v646_v53, 1  ;;  %v652_v59 = vadd.f32 %v651_v33, %v650_v11  ;;  %v719_v61 = vunpack.c.l.b16 %v680_v54  ;;  %v967_v54 = vld [vmem:[%s1698_s4] ss:$0 sm:$0xff] }
 0x1a9   : > { %v628_v62 = vmul.f32 %v620_v55, %v473_v34  ;;  %v655_v35 = vrot.slane %v627_v56, 4 }
 0x1aa   : > { %v648_v1 = vadd.f32 %v647_v58, %v646_v53  ;;  %v653_v42 = vrot.slane %v652_v59, 1  ;;  %v727_v29 = vsel %vm726_vm1, %v719_v61, %v718_v60 }
 0x1ab   : > { %v1149_v63 = vpop.eup %1148  ;;  %v656_v0 = vadd.f32 %v655_v35, %v627_v56  ;;  %v661_v2 = vrot.slane %v628_v62, 4 }
 0x1ac   : > { %v621_v7 = vmul.f32 %v1149_v63, %v1610_v50  ;;  %v654_v37 = vadd.f32 %v653_v42, %v652_v59  ;;  %v681_v38 = vpack.c.bf16 %v648_v1, %v648_v1 }
 0x1ad   : > { %v1151_v5 = vpop.eup %1150  ;;  %v657_v9 = vrot.slane %v656_v0, 2  ;;  %v662_v8 = vadd.f32 %v661_v2, %v628_v62 }
 0x1ae   : > { %v622_v49 = vmul.f32 %v1151_v5, %v1618_v57  ;;  %v629_v10 = vmul.f32 %v621_v7, %v479_v3  ;;  %v682_v12 = vpack.c.bf16 %v654_v37, %v654_v37  ;;  %v720_v13 = vunpack.c.l.b16 %v681_v38 }
 0x1af   : > { %v658_v14 = vadd.f32 %v657_v9, %v656_v0  ;;  %v663_v15 = vrot.slane %v662_v8, 2 }
 0x1b0   : > { %v630_v21 = vmul.f32 %v622_v49, %v483_v6  ;;  %v667_v16 = vrot.slane %v629_v10, 4  ;;  %v721_v50 = vunpack.c.l.b16 %v682_v12  ;;  %v729_v17 = vsel %vm728_vm2, %v720_v13, %v727_v29 }
 0x1b1   : > { %v659_v18 = vrot.slane %v658_v14, 1  ;;  %v664_v19 = vadd.f32 %v663_v15, %v662_v8 }
 0x1b2   : > { %v668_v20 = vadd.f32 %v667_v16, %v629_v10  ;;  %v673_v22 = vrot.slane %v630_v21, 4  ;;  %v731_v28 = vsel %vm730_vm3, %v721_v50, %v729_v17 }
 0x1b3   : > { %v660_v41 = vadd.f32 %v659_v18, %v658_v14  ;;  %v665_v23 = vrot.slane %v664_v19, 1 }
 0x1b4   : > { %v669_v24 = vrot.slane %v668_v20, 2  ;;  %v674_v25 = vadd.f32 %v673_v22, %v630_v21 }
 0x1b5   : > { %v666_v57 = vadd.f32 %v665_v23, %v664_v19  ;;  %v683_v46 = vpack.c.bf16 %v660_v41, %v660_v41 }
 0x1b6   : > { %v670_v26 = vadd.f32 %v669_v24, %v668_v20  ;;  %v675_v27 = vrot.slane %v674_v25, 2 }
 0x1b7   : > { %v684_v30 = vpack.c.bf16 %v666_v57, %v666_v57  ;;  %v722_v32 = vunpack.c.l.b16 %v683_v46 }
 0x1b8   : > { %v671_v4 = vrot.slane %v670_v26, 1  ;;  %v676_v36 = vadd.f32 %v675_v27, %v674_v25 }
 0x1b9   : > { %v723_v39 = vunpack.c.l.b16 %v684_v30  ;;  %v733_v40 = vsel %vm732_vm4, %v722_v32, %v731_v28 }
 0x1ba   : > { %v672_v43 = vadd.f32 %v671_v4, %v670_v26  ;;  %v677_v51 = vrot.slane %v676_v36, 1 }
 0x1bb   : > { %v735_v44 = vsel %vm734_vm5, %v723_v39, %v733_v40 }
 0x1bc   : > { %v678_v31 = vadd.f32 %v677_v51, %v676_v36  ;;  %v685_v11 = vpack.c.bf16 %v672_v43, %v672_v43 }
 0x1be   : > { %v686_v45 = vpack.c.bf16 %v678_v31, %v678_v31  ;;  %v724_v47 = vunpack.c.l.b16 %v685_v11 }
 0x1c0   : > { %v725_v48 = vunpack.c.l.b16 %v686_v45  ;;  %v737_v52 = vsel %vm736_vm6, %v724_v47, %v735_v44 }
 0x1c2   : > { %v739_v53 = vsel %vm738_vm7, %v725_v48, %v737_v52 }
 0x1c3   : > { %v740_v33 = vpack.c.b16 %v739_v53, %v739_v53 }
 0x1c5   : > { %1007 = vmatmul.mubr.bf16.vlgmr.msra.gmra.mrb[0].mxu1 %v740_v33 }
 0x298   : > { %v824_v34 = vpop.f32.mrb[0].mxu1 }
 0x299   : > { %v825_v55 = vadd.f32 %v967_v54, %v824_v34  ;;  %v1008_v56 = vpop.f32.mrb[1].mxu1 }
 0x29a   : > { %v827_v58 = vpop.f32.mrb[2].mxu1 }
 0x29b   : > { %830 = vst [vmem:[%s271_s14] sm:$0xff] %v825_v55  ;;  %v1009_v59 = vpop.f32.mrb[3].mxu1 }
 0x29c   : > { %1251 = shalt.err (!%p1248_p2)
}
 0x29d   : > { %s1252_s17 = scalar_lea.hbm %s1650_s23, 128  ;;  %s1256_s12 = scalar_lea.hbm %s1699_s5, 256 }
 0x29e   : > { %p1253_p13 = scmp.ne.s32.totalorder %s1650_s23, %s1252_s17  ;;  %p1257_p4 = scmp.lt.u32.totalorder %s1650_s23, %s1699_s5 }
 0x29f   : > { %p1258_p7 = scmp.lt.u32.totalorder %s1256_s12, %s1252_s17  ;;  %p1260_p11 = scmp.lt.u32.totalorder %s1252_s17, %s1650_s23 }
 0x2a0   : > { %p1254_p6 = pnand %p1253_p13, %p1713_p0 }
 0x2a1   : > { %p1259_p8 = por %p1258_p7, %p1257_p4 }
 0x2a2   : > { %p1255_p10 = pneg %p1254_p6 }
 0x2a3   : > { %p1261_p1 = por %p1260_p11, %p1259_p8 }
 0x2a5   : > { %p1262_p3 = pnand %p1261_p1, %p1255_p10 }
 0x2a7   : > { %1265 = shalt.err (!%p1262_p3)
}
 0x2a8   : > { %1020 = dma.vmem_to_hbm [thread:$0]  (%p1713_p0), %s1652_s15, 128, %s1650_s23, %s832_s7  }
 0x2a9 PF: > { %s857_s28 = sand.u32 1, %s1296_s18   ;;  %p1714_p5 = scmp.ne.s32.totalorder %s1704_s25, 0 }
 0x2aa   : > { %p1715_p9 = scmp.ge.s32.totalorder %s1308_s21, 2  ;;  %s858_s14 = scalar_lea.sflag [#allocation4], %s857_s28 }
 0x2ac   : > { %p1034_p12 = pnand %p1715_p9, %p1714_p5 }
 0x2ae   : > { %1291 = dma.done.wait (!%p1034_p12), %s858_s14, 128  }
 0x2af   : > { %1293 = vsyncadd (!%p1034_p12), %s858_s14, 4294967168  ;;  %p19_p2 = scmp.ge.s32.totalorder %s1464_s16, 4   ;;  %s1716_s18 = smov %s1300_s19 }
 0x2b0   : > { %s1717_s19 = smov %s1304_s20  ;;  %s1718_s20 = smov %s1473_s27 }
 0x2b1   : > { %s1719_s21 = smov %s1464_s16  ;;  %21 = sbr.rel (!%p19_p2) target bundleno = 6 (0x6), region = 93 }
 0x2b8   :  { %863 = vsyncpa [#allocation3], 1 }
 0x2b9   :  { %865 = vsyncpa [#allocation3 + $0x1], 1 }
 0x2ba   :  { %866 = vsyncpa [#allocation6], 1 }
 0x2bb   :  { %867 = vsyncpa [#allocation4], 1 }
 0x2bc   :  { %869 = vsyncpa [#allocation4 + $0x1], 1 }

</bundles_post_ra>
